<compile_context>
chip_gen: v6e
topology: v6e:2x2x1
jax: 0.10.0
libtpu: 0.0.40
codegen_flags: <defaults>
</compile_context>

<pallas_src>
import jax
import jax.numpy as jnp
from jax.experimental import pallas as pl
from jax.experimental.pallas import tpu as pltpu


def _round_up(x, m):
    return (x + m - 1) // m * m


def _make_kernel(num_extra_fc, compute_dtype):
    """Kernel body.

    Ref order: x_cat, (w_se, b_se, w_ae, b_ae), (w1t, w1s, w1a, b1),
               [w_i, b_i]*num_extra_fc, (w_out, b_out), out.
    w_se / w_ae / w1t are zero-row-embedded to the padded concat width, so the
    torch concat is reproduced without any in-kernel slicing.
    """

    def kernel(*refs):
        f32 = jnp.float32
        x_ref = refs[0]
        w_se_ref, b_se_ref, w_ae_ref, b_ae_ref = refs[1:5]
        w1t_ref, w1s_ref, w1a_ref, b1_ref = refs[5:9]
        idx = 9
        extra_fc = []
        for _ in range(num_extra_fc):
            extra_fc.append((refs[idx], refs[idx + 1]))
            idx += 2
        wout_ref, bout_ref = refs[idx], refs[idx + 1]
        out_ref = refs[idx + 2]

        x = x_ref[...]

        # Feature extractors (Linear + relu) straight off the concat stream.
        hs = jnp.maximum(
            jnp.dot(x, w_se_ref[...], preferred_element_type=f32)
            + b_se_ref[...], 0.0).astype(compute_dtype)
        ha = jnp.maximum(
            jnp.dot(x, w_ae_ref[...], preferred_element_type=f32)
            + b_ae_ref[...], 0.0).astype(compute_dtype)

        # fc layer 0 on concat(task, hs, ha) via the row-split weight.
        h = (jnp.dot(x, w1t_ref[...], preferred_element_type=f32)
             + jnp.dot(hs, w1s_ref[...], preferred_element_type=f32)
             + jnp.dot(ha, w1a_ref[...], preferred_element_type=f32)
             + b1_ref[...])
        h = jnp.maximum(h, 0.0).astype(compute_dtype)

        # Remaining fc layers.
        for w_ref, b_ref in extra_fc:
            h = jnp.maximum(
                jnp.dot(h, w_ref[...], preferred_element_type=f32) + b_ref[...],
                0.0).astype(compute_dtype)

        # fc_out (gaussian head is a plain linear layer; no activation).
        out_ref[...] = (
            jnp.dot(h, wout_ref[...], preferred_element_type=f32)
            + bout_ref[...]).astype(out_ref.dtype)

    return kernel


def state_transition_decoder_forward(task_embedding, state, action, params,
                                     *, block_b=4096,
                                     compute_dtype=jnp.bfloat16,
                                     out_dtype=None):
    if out_dtype is None:
        out_dtype = compute_dtype

    B, td = task_embedding.shape
    sd = state.shape[1]
    ad = action.shape[1]
    out_dim = params["w_out"].shape[1]
    num_extra_fc = len(params["fc"])

    # ---- batch tiling -----------------------------------------------------
    SUBLANE = 16                     # bf16 sublane packing (fine for f32 too)
    MIN_GRID = 4                     # keep >=4 steps so v7x megacore has work
    TB = _round_up(min(block_b, _round_up(B, SUBLANE)), SUBLANE)
    if B > MIN_GRID * SUBLANE:
        TB = min(TB, _round_up((B + MIN_GRID - 1) // MIN_GRID, SUBLANE))
    TB = max(TB, SUBLANE)
    Bp = _round_up(B, TB)

    # ---- single concatenated activation stream ----------------------------
    total_in = td + sd + ad
    in_pad = _round_up(total_in, 8)
    x = jnp.concatenate([task_embedding, state, action], axis=1)
    x = jnp.pad(x, ((0, Bp - B), (0, in_pad - total_in)))
    x = x.astype(compute_dtype)

    # ---- weights: embed sub-input matrices into the padded concat width ---
    def embed_rows(w, start):
        full = jnp.zeros((in_pad, w.shape[1]), w.dtype)
        return full.at[start:start + w.shape[0]].set(w)

    def wcast(w):
        return w.astype(compute_dtype)

    def bcast(b):
        return b.astype(jnp.float32)

    weights = [
        wcast(embed_rows(params["w_se"], td)), bcast(params["b_se"]),
        wcast(embed_rows(params["w_ae"], td + sd)), bcast(params["b_ae"]),
        wcast(embed_rows(params["w1t"], 0)),
        wcast(params["w1s"]), wcast(params["w1a"]), bcast(params["b1"]),
    ]
    for w, b in params["fc"]:
        weights += [wcast(w), bcast(b)]
    weights += [wcast(params["w_out"]), bcast(params["b_out"])]

    grid = (Bp // TB,)

    x_spec = pl.BlockSpec((TB, in_pad), lambda i: (i, 0))

    def resident_spec(arr):
        # Full-array block + constant index_map: loaded once, VMEM-resident.
        return pl.BlockSpec(arr.shape, lambda i: (0, 0))

    in_specs = [x_spec] + [resident_spec(w) for w in weights]
    # out block width == out_dim (full array dim) -> no 128-lane padding,
    # no post-kernel column slice.
    out_spec = pl.BlockSpec((TB, out_dim), lambda i: (i, 0))

    # ---- cost estimate & compiler params ----------------------------------
    se_dim = params["w_se"].shape[1]
    ae_dim = params["w_ae"].shape[1]
    l0 = params["b1"].shape[1]
    macs = in_pad * (se_dim + ae_dim + l0) + se_dim * l0 + ae_dim * l0
    prev = l0
    for w, _ in params["fc"]:
        macs += prev * w.shape[1]
        prev = w.shape[1]
    macs += prev * out_dim
    w_bytes = sum(int(w.size) * w.dtype.itemsize for w in weights)
    out_bytes = Bp * out_dim * jnp.dtype(out_dtype).itemsize
    cost = pl.CostEstimate(
        flops=2 * Bp * macs,
        transcendentals=0,
        bytes_accessed=int(x.size) * x.dtype.itemsize + w_bytes + out_bytes)

    x_blk_bytes = TB * in_pad * jnp.dtype(compute_dtype).itemsize
    o_blk_bytes = TB * out_dim * jnp.dtype(out_dtype).itemsize
    vmem_est = 2 * (x_blk_bytes + o_blk_bytes + w_bytes) + (2 << 20)
    cp_kwargs = dict(dimension_semantics=("parallel",))
    if vmem_est > (12 << 20):          # only override v5e's 16 MiB default if needed
        cp_kwargs["vmem_limit_bytes"] = int(min(vmem_est + (4 << 20), 64 << 20))

    out = pl.pallas_call(
        _make_kernel(num_extra_fc, compute_dtype),
        out_shape=jax.ShapeDtypeStruct((Bp, out_dim), out_dtype),
        grid=grid,
        in_specs=in_specs,
        out_specs=out_spec,
        compiler_params=pltpu.CompilerParams(**cp_kwargs),
        cost_estimate=cost,
    )(x, *weights)

    # Only a row slice, and only when the batch actually needed padding.
    return out if Bp == B else out[:B]


def init_params(key, task_embedding_size, state_size, state_embed_size,
                action_size, action_embed_size, layers, pred_type='gaussian'):
    """Deterministic synthetic init. Weights are [in, out]; biases are [1, out]."""
    n_lin = 3 + len(layers)
    keys = jax.random.split(key, 2 * n_lin)
    kit = iter(keys)

    def lin(fan_in, fan_out):
        w = jax.random.normal(next(kit), (fan_in, fan_out), jnp.float32) * 0.1
        b = jax.random.normal(next(kit), (1, fan_out), jnp.float32) * 0.1
        return w, b

    p = {}
    p["w_se"], p["b_se"] = lin(state_size, state_embed_size)
    p["w_ae"], p["b_ae"] = lin(action_size, action_embed_size)

    in0 = task_embedding_size + state_embed_size + action_embed_size
    w1, p["b1"] = lin(in0, layers[0])
    # Split first-layer weight rows to match concat(task, hs, ha).
    p["w1t"] = w1[:task_embedding_size]
    p["w1s"] = w1[task_embedding_size:task_embedding_size + state_embed_size]
    p["w1a"] = w1[task_embedding_size + state_embed_size:]

    cur = layers[0]
    p["fc"] = []
    for width in layers[1:]:
        p["fc"].append(lin(cur, width))
        cur = width

    out_dim = 2 * state_size if pred_type == 'gaussian' else state_size
    p["w_out"], p["b_out"] = lin(cur, out_dim)
    return p


def reference_forward(task_embedding, state, action, params):
    hs = jax.nn.relu(state @ params["w_se"] + params["b_se"])
    ha = jax.nn.relu(action @ params["w_ae"] + params["b_ae"])
    w1 = jnp.concatenate([params["w1t"], params["w1s"], params["w1a"]], axis=0)
    h = jnp.concatenate([task_embedding, hs, ha], axis=-1)
    h = jax.nn.relu(h @ w1 + params["b1"])
    for w, b in params["fc"]:
        h = jax.nn.relu(h @ w + b)
    return h @ params["w_out"] + params["b_out"]


if __name__ == "__main__":
    # Small configuration consistent with the module's __init__.
    B = 24
    task_embedding_size = 32
    state_size = 16
    state_embed_size = 32
    action_size = 4
    action_embed_size = 16
    layers = (64, 32)

    key = jax.random.PRNGKey(0)
    k_params, k_task, k_s, k_a = jax.random.split(key, 4)

    params = init_params(k_params, task_embedding_size, state_size,
                         state_embed_size, action_size, action_embed_size,
                         layers, pred_type='gaussian')

    task_embedding = jax.random.normal(k_task, (B, task_embedding_size), jnp.float32)
    state = jax.random.normal(k_s, (B, state_size), jnp.float32)
    action = jax.random.normal(k_a, (B, action_size), jnp.float32)

    ref = reference_forward(task_embedding, state, action, params)

    # block_b=16 exercises a multi-step batch grid at this tiny demo size;
    # production batch sizes would use the default (4096-row cap, >=4 steps).

    # 1) f32 path: bit-tight parity with the reference.
    out_f32 = state_transition_decoder_forward(
        task_embedding, state, action, params, block_b=16,
        compute_dtype=jnp.float32, out_dtype=jnp.float32)
    out_f32 = jax.block_until_ready(out_f32)
    assert out_f32.shape == (B, 2 * state_size)
    assert jnp.allclose(out_f32, ref, atol=1e-4, rtol=1e-4), "f32 mismatch vs reference"

    # 2) default bf16-I/O path (f32 accumulation): loosened tolerance.
    out_bf16 = state_transition_decoder_forward(
        task_embedding, state, action, params, block_b=16)
    out_bf16 = jax.block_until_ready(out_bf16)
    assert out_bf16.shape == (B, 2 * state_size)
    assert jnp.allclose(out_bf16.astype(jnp.float32), ref, atol=3e-2, rtol=3e-2), \
        "bf16 mismatch vs reference"

    print("KERNEL_OK")
</pallas_src>

<mosaic_0001>
module attributes {stable_mosaic.version = 11 : i64} {
  func.func @kernel(%arg0: i32, %arg1: memref<16x56xf32, #tpu.memory_space<vmem>>, %arg2: memref<56x32xf32, #tpu.memory_space<vmem>>, %arg3: memref<1x32xf32, #tpu.memory_space<vmem>>, %arg4: memref<56x16xf32, #tpu.memory_space<vmem>>, %arg5: memref<1x16xf32, #tpu.memory_space<vmem>>, %arg6: memref<56x64xf32, #tpu.memory_space<vmem>>, %arg7: memref<32x64xf32, #tpu.memory_space<vmem>>, %arg8: memref<16x64xf32, #tpu.memory_space<vmem>>, %arg9: memref<1x64xf32, #tpu.memory_space<vmem>>, %arg10: memref<64x32xf32, #tpu.memory_space<vmem>>, %arg11: memref<1x32xf32, #tpu.memory_space<vmem>>, %arg12: memref<32x32xf32, #tpu.memory_space<vmem>>, %arg13: memref<1x32xf32, #tpu.memory_space<vmem>>, %arg14: memref<16x32xf32, #tpu.memory_space<vmem>>) attributes {dimension_semantics = [#tpu.dimension_semantics<parallel>], iteration_bounds = array<i64: 2>, scalar_prefetch = 0 : i64, scratch_operands = 0 : i64, tpu.core_type = #tpu.core_type<tc>, window_params = [{transform_indices = @transform_0, window_bounds = array<i64: 16, 56>}, {pipeline_mode = #tpu.pipeline_mode<synchronous>, transform_indices = @transform_1, window_bounds = array<i64: 56, 32>}, {pipeline_mode = #tpu.pipeline_mode<synchronous>, transform_indices = @transform_2, window_bounds = array<i64: 1, 32>}, {pipeline_mode = #tpu.pipeline_mode<synchronous>, transform_indices = @transform_3, window_bounds = array<i64: 56, 16>}, {pipeline_mode = #tpu.pipeline_mode<synchronous>, transform_indices = @transform_4, window_bounds = array<i64: 1, 16>}, {pipeline_mode = #tpu.pipeline_mode<synchronous>, transform_indices = @transform_5, window_bounds = array<i64: 56, 64>}, {pipeline_mode = #tpu.pipeline_mode<synchronous>, transform_indices = @transform_6, window_bounds = array<i64: 32, 64>}, {pipeline_mode = #tpu.pipeline_mode<synchronous>, transform_indices = @transform_7, window_bounds = array<i64: 16, 64>}, {pipeline_mode = #tpu.pipeline_mode<synchronous>, transform_indices = @transform_8, window_bounds = array<i64: 1, 64>}, {pipeline_mode = #tpu.pipeline_mode<synchronous>, transform_indices = @transform_9, window_bounds = array<i64: 64, 32>}, {pipeline_mode = #tpu.pipeline_mode<synchronous>, transform_indices = @transform_10, window_bounds = array<i64: 1, 32>}, {pipeline_mode = #tpu.pipeline_mode<synchronous>, transform_indices = @transform_11, window_bounds = array<i64: 32, 32>}, {pipeline_mode = #tpu.pipeline_mode<synchronous>, transform_indices = @transform_12, window_bounds = array<i64: 1, 32>}, {transform_indices = @transform_13, window_bounds = array<i64: 16, 32>}]} {
    %c0 = arith.constant 0 : index
    %c0_0 = arith.constant 0 : index
    %0 = vector.load %arg1[%c0, %c0_0] : memref<16x56xf32, #tpu.memory_space<vmem>>, vector<16x56xf32>
    %c0_1 = arith.constant 0 : index
    %c0_2 = arith.constant 0 : index
    %1 = vector.load %arg2[%c0_1, %c0_2] : memref<56x32xf32, #tpu.memory_space<vmem>>, vector<56x32xf32>
    %cst = arith.constant dense<0.000000e+00> : vector<16x32xf32>
    %2 = tpu.matmul %0, %1, %cst {dimension_numbers = #tpu.dot_dimension_numbers<[1], [0], [0], [1], [0, 0, 1, 1], [], []>} : vector<16x56xf32>, vector<56x32xf32>, vector<16x32xf32> -> vector<16x32xf32>
    %c0_3 = arith.constant 0 : index
    %c0_4 = arith.constant 0 : index
    %3 = vector.load %arg3[%c0_3, %c0_4] : memref<1x32xf32, #tpu.memory_space<vmem>>, vector<1x32xf32>
    %4 = vector.broadcast %3 : vector<1x32xf32> to vector<16x32xf32>
    %5 = arith.addf %2, %4 : vector<16x32xf32>
    %cst_5 = arith.constant 0.000000e+00 : f32
    %6 = vector.broadcast %cst_5 : f32 to vector<16x32xf32>
    %7 = arith.maximumf %5, %6 : vector<16x32xf32>
    %c0_6 = arith.constant 0 : index
    %c0_7 = arith.constant 0 : index
    %8 = vector.load %arg4[%c0_6, %c0_7] : memref<56x16xf32, #tpu.memory_space<vmem>>, vector<56x16xf32>
    %cst_8 = arith.constant dense<0.000000e+00> : vector<16x16xf32>
    %9 = tpu.matmul %0, %8, %cst_8 {dimension_numbers = #tpu.dot_dimension_numbers<[1], [0], [0], [1], [0, 0, 1, 1], [], []>} : vector<16x56xf32>, vector<56x16xf32>, vector<16x16xf32> -> vector<16x16xf32>
    %c0_9 = arith.constant 0 : index
    %c0_10 = arith.constant 0 : index
    %10 = vector.load %arg5[%c0_9, %c0_10] : memref<1x16xf32, #tpu.memory_space<vmem>>, vector<1x16xf32>
    %11 = vector.broadcast %10 : vector<1x16xf32> to vector<16x16xf32>
    %12 = arith.addf %9, %11 : vector<16x16xf32>
    %cst_11 = arith.constant 0.000000e+00 : f32
    %13 = vector.broadcast %cst_11 : f32 to vector<16x16xf32>
    %14 = arith.maximumf %12, %13 : vector<16x16xf32>
    %c0_12 = arith.constant 0 : index
    %c0_13 = arith.constant 0 : index
    %15 = vector.load %arg6[%c0_12, %c0_13] : memref<56x64xf32, #tpu.memory_space<vmem>>, vector<56x64xf32>
    %cst_14 = arith.constant dense<0.000000e+00> : vector<16x64xf32>
    %16 = tpu.matmul %0, %15, %cst_14 {dimension_numbers = #tpu.dot_dimension_numbers<[1], [0], [0], [1], [0, 0, 1, 1], [], []>} : vector<16x56xf32>, vector<56x64xf32>, vector<16x64xf32> -> vector<16x64xf32>
    %c0_15 = arith.constant 0 : index
    %c0_16 = arith.constant 0 : index
    %17 = vector.load %arg7[%c0_15, %c0_16] : memref<32x64xf32, #tpu.memory_space<vmem>>, vector<32x64xf32>
    %cst_17 = arith.constant dense<0.000000e+00> : vector<16x64xf32>
    %18 = tpu.matmul %7, %17, %cst_17 {dimension_numbers = #tpu.dot_dimension_numbers<[1], [0], [0], [1], [0, 0, 1, 1], [], []>} : vector<16x32xf32>, vector<32x64xf32>, vector<16x64xf32> -> vector<16x64xf32>
    %19 = arith.addf %16, %18 : vector<16x64xf32>
    %c0_18 = arith.constant 0 : index
    %c0_19 = arith.constant 0 : index
    %20 = vector.load %arg8[%c0_18, %c0_19] : memref<16x64xf32, #tpu.memory_space<vmem>>, vector<16x64xf32>
    %cst_20 = arith.constant dense<0.000000e+00> : vector<16x64xf32>
    %21 = tpu.matmul %14, %20, %cst_20 {dimension_numbers = #tpu.dot_dimension_numbers<[1], [0], [0], [1], [0, 0, 1, 1], [], []>} : vector<16x16xf32>, vector<16x64xf32>, vector<16x64xf32> -> vector<16x64xf32>
    %22 = arith.addf %19, %21 : vector<16x64xf32>
    %c0_21 = arith.constant 0 : index
    %c0_22 = arith.constant 0 : index
    %23 = vector.load %arg9[%c0_21, %c0_22] : memref<1x64xf32, #tpu.memory_space<vmem>>, vector<1x64xf32>
    %24 = vector.broadcast %23 : vector<1x64xf32> to vector<16x64xf32>
    %25 = arith.addf %22, %24 : vector<16x64xf32>
    %cst_23 = arith.constant 0.000000e+00 : f32
    %26 = vector.broadcast %cst_23 : f32 to vector<16x64xf32>
    %27 = arith.maximumf %25, %26 : vector<16x64xf32>
    %c0_24 = arith.constant 0 : index
    %c0_25 = arith.constant 0 : index
    %28 = vector.load %arg10[%c0_24, %c0_25] : memref<64x32xf32, #tpu.memory_space<vmem>>, vector<64x32xf32>
    %cst_26 = arith.constant dense<0.000000e+00> : vector<16x32xf32>
    %29 = tpu.matmul %27, %28, %cst_26 {dimension_numbers = #tpu.dot_dimension_numbers<[1], [0], [0], [1], [0, 0, 1, 1], [], []>} : vector<16x64xf32>, vector<64x32xf32>, vector<16x32xf32> -> vector<16x32xf32>
    %c0_27 = arith.constant 0 : index
    %c0_28 = arith.constant 0 : index
    %30 = vector.load %arg11[%c0_27, %c0_28] : memref<1x32xf32, #tpu.memory_space<vmem>>, vector<1x32xf32>
    %31 = vector.broadcast %30 : vector<1x32xf32> to vector<16x32xf32>
    %32 = arith.addf %29, %31 : vector<16x32xf32>
    %cst_29 = arith.constant 0.000000e+00 : f32
    %33 = vector.broadcast %cst_29 : f32 to vector<16x32xf32>
    %34 = arith.maximumf %32, %33 : vector<16x32xf32>
    %c0_30 = arith.constant 0 : index
    %c0_31 = arith.constant 0 : index
    %35 = vector.load %arg12[%c0_30, %c0_31] : memref<32x32xf32, #tpu.memory_space<vmem>>, vector<32x32xf32>
    %cst_32 = arith.constant dense<0.000000e+00> : vector<16x32xf32>
    %36 = tpu.matmul %34, %35, %cst_32 {dimension_numbers = #tpu.dot_dimension_numbers<[1], [0], [0], [1], [0, 0, 1, 1], [], []>} : vector<16x32xf32>, vector<32x32xf32>, vector<16x32xf32> -> vector<16x32xf32>
    %c0_33 = arith.constant 0 : index
    %c0_34 = arith.constant 0 : index
    %37 = vector.load %arg13[%c0_33, %c0_34] : memref<1x32xf32, #tpu.memory_space<vmem>>, vector<1x32xf32>
    %38 = vector.broadcast %37 : vector<1x32xf32> to vector<16x32xf32>
    %39 = arith.addf %36, %38 : vector<16x32xf32>
    %c0_35 = arith.constant 0 : index
    %c0_36 = arith.constant 0 : index
    %40 = vector.load %arg14[%c0_35, %c0_36] : memref<16x32xf32, #tpu.memory_space<vmem>>, vector<16x32xf32>
    tpu.vector_store %arg14[%c0_35, %c0_36], %39 {strides = array<i32>} : memref<16x32xf32, #tpu.memory_space<vmem>>, vector<16x32xf32>,
    return
  }
  func.func @transform_0(%arg0: i32) -> (i32, i32) {
    %c0_i32 = arith.constant 0 : i32
    %c0_i32_0 = arith.constant 0 : i32
    return %arg0, %c0_i32 : i32, i32
  }
  func.func @transform_1(%arg0: i32) -> (i32, i32) {
    %c0_i32 = arith.constant 0 : i32
    %c0_i32_0 = arith.constant 0 : i32
    %c0_i32_1 = arith.constant 0 : i32
    return %c0_i32, %c0_i32_0 : i32, i32
  }
  func.func @transform_2(%arg0: i32) -> (i32, i32) {
    %c0_i32 = arith.constant 0 : i32
    %c0_i32_0 = arith.constant 0 : i32
    %c0_i32_1 = arith.constant 0 : i32
    return %c0_i32, %c0_i32_0 : i32, i32
  }
  func.func @transform_3(%arg0: i32) -> (i32, i32) {
    %c0_i32 = arith.constant 0 : i32
    %c0_i32_0 = arith.constant 0 : i32
    %c0_i32_1 = arith.constant 0 : i32
    return %c0_i32, %c0_i32_0 : i32, i32
  }
  func.func @transform_4(%arg0: i32) -> (i32, i32) {
    %c0_i32 = arith.constant 0 : i32
    %c0_i32_0 = arith.constant 0 : i32
    %c0_i32_1 = arith.constant 0 : i32
    return %c0_i32, %c0_i32_0 : i32, i32
  }
  func.func @transform_5(%arg0: i32) -> (i32, i32) {
    %c0_i32 = arith.constant 0 : i32
    %c0_i32_0 = arith.constant 0 : i32
    %c0_i32_1 = arith.constant 0 : i32
    return %c0_i32, %c0_i32_0 : i32, i32
  }
  func.func @transform_6(%arg0: i32) -> (i32, i32) {
    %c0_i32 = arith.constant 0 : i32
    %c0_i32_0 = arith.constant 0 : i32
    %c0_i32_1 = arith.constant 0 : i32
    return %c0_i32, %c0_i32_0 : i32, i32
  }
  func.func @transform_7(%arg0: i32) -> (i32, i32) {
    %c0_i32 = arith.constant 0 : i32
    %c0_i32_0 = arith.constant 0 : i32
    %c0_i32_1 = arith.constant 0 : i32
    return %c0_i32, %c0_i32_0 : i32, i32
  }
  func.func @transform_8(%arg0: i32) -> (i32, i32) {
    %c0_i32 = arith.constant 0 : i32
    %c0_i32_0 = arith.constant 0 : i32
    %c0_i32_1 = arith.constant 0 : i32
    return %c0_i32, %c0_i32_0 : i32, i32
  }
  func.func @transform_9(%arg0: i32) -> (i32, i32) {
    %c0_i32 = arith.constant 0 : i32
    %c0_i32_0 = arith.constant 0 : i32
    %c0_i32_1 = arith.constant 0 : i32
    return %c0_i32, %c0_i32_0 : i32, i32
  }
  func.func @transform_10(%arg0: i32) -> (i32, i32) {
    %c0_i32 = arith.constant 0 : i32
    %c0_i32_0 = arith.constant 0 : i32
    %c0_i32_1 = arith.constant 0 : i32
    return %c0_i32, %c0_i32_0 : i32, i32
  }
  func.func @transform_11(%arg0: i32) -> (i32, i32) {
    %c0_i32 = arith.constant 0 : i32
    %c0_i32_0 = arith.constant 0 : i32
    %c0_i32_1 = arith.constant 0 : i32
    return %c0_i32, %c0_i32_0 : i32, i32
  }
  func.func @transform_12(%arg0: i32) -> (i32, i32) {
    %c0_i32 = arith.constant 0 : i32
    %c0_i32_0 = arith.constant 0 : i32
    %c0_i32_1 = arith.constant 0 : i32
    return %c0_i32, %c0_i32_0 : i32, i32
  }
  func.func @transform_13(%arg0: i32) -> (i32, i32) {
    %c0_i32 = arith.constant 0 : i32
    %c0_i32_0 = arith.constant 0 : i32
    return %arg0, %c0_i32 : i32, i32
  }
}

</mosaic_0001>

<bundles_post_ra>
// kernel: tpu_custom_call.1
= control target key start
LH: loop header
LB: loop body
LE: loop exit
PB: predicated region body
PF: predicated region fallthrough
CT: control target
= control target key end

     0   :  { %18 = vsyncpa [#allocation3], 0  ;;  %s1772_s0 = inlined_call_operand.vmem [shape: f32[32,56], index: 0, kind: input, shape index: {}]   ;;  %s1773_s1 = inlined_call_operand.vmem [shape: f32[56,32], index: 1, kind: input, shape index: {}]   ;;  %s1774_s2 = inlined_call_operand.vmem [shape: f32[1,32], index: 2, kind: input, shape index: {}]   ;;  %s1775_s3 = inlined_call_operand.vmem [shape: f32[56,16], index: 3, kind: input, shape index: {}]   ;;  %s1776_s4 = inlined_call_operand.vmem [shape: f32[1,16], index: 4, kind: input, shape index: {}]   ;;  %s1777_s5 = inlined_call_operand.vmem [shape: f32[56,64], index: 5, kind: input, shape index: {}]   ;;  %s1778_s6 = inlined_call_operand.vmem [shape: f32[32,64], index: 6, kind: input, shape index: {}]   ;;  %s1779_s7 = inlined_call_operand.vmem [shape: f32[16,64], index: 7, kind: input, shape index: {}]   ;;  %s1780_s8 = inlined_call_operand.vmem [shape: f32[1,64], index: 8, kind: input, shape index: {}]   ;;  %s1781_s9 = inlined_call_operand.vmem [shape: f32[64,32], index: 9, kind: input, shape index: {}]   ;;  %s1782_s10 = inlined_call_operand.vmem [shape: f32[1,32], index: 10, kind: input, shape index: {}]   ;;  %s1783_s11 = inlined_call_operand.vmem [shape: f32[32,32], index: 11, kind: input, shape index: {}]   ;;  %s1784_s12 = inlined_call_operand.vmem [shape: f32[1,32], index: 12, kind: input, shape index: {}]   ;;  %s1785_s13 = inlined_call_operand.hbm [shape: f32[32,32], index: 13, kind: output, shape index: {}]  }
   0x1   :  { %20 = vsyncpa [#allocation3 + $0x1], 0  ;;  %s1527_s25 = smov 0   ;;  %s1529_s26 = smov 0  }
   0x2   :  { %s1531_s27 = smov 0   ;;  %s1533_s28 = smov 0  }
   0x3 LB: > { %1790 = sst [smem:[#allocation5_spill]] %s1448_s27  ;;  %s1548_s29 = sadd.s32 4294967295, %s1452_s28   ;;  %s1452_s28 = sphi %s1533_s28, %s1797_s28   ;;  %s1448_s27 = sphi %s1531_s27, %s1799_s27   ;;  %s1444_s26 = sphi %s1529_s26, %s1801_s26   ;;  %s1440_s25 = sphi %s1527_s25, %s1800_s25  }
   0x4   : > { %s1167_s30 = sadd.s32 4294967294, %s1452_s28   ;;  %s1552_s14 = sadd.s32 1, %s1452_s28  }
   0x5   : > { %1791 = sst [smem:[#allocation6_spill]] %s1552_s14  ;;  %s311_s15 = sadd.s32 1, %s1448_s27 }
   0x6   : > { %s308_s16 = ssub.s32 %s1452_s28, %s1552_s14  ;;  %p321_p0 = scmp.ne.s32.totalorder %s1448_s27, %s1444_s26 }
   0x7   : > { %p309_p1 = scmp.eq.s32.totalorder %s308_s16, 0  ;;  %p322_p2 = scmp.eq.s32.totalorder %s1548_s29, 1 }
   0x8   : > { %p327_p3 = scmp.ne.s32.totalorder %s1444_s26, %s1440_s25  ;;  %p328_p4 = scmp.eq.s32.totalorder %s1167_s30, 1 }
   0x9   : > { %s1563_s17 = scalar_select %p309_p1, %s1448_s27, %s311_s15  }
   0xa   : > { %p1565_p5 = por %p322_p2, %p321_p0  ;;  %p1569_p6 = por %p328_p4, %p327_p3 }
   0xb   : > { %1792 = sst [smem:[#allocation7_spill]] %s1563_s17  ;;  %p1170_p7 = scmp.ge.s32.totalorder %s1452_s28, 1 }
   0xc   : > { %s1794_s19 = scalar_select %p1569_p6, 1, 0 }
   0xd   : > { %p391_p8 = scmp.lt.s32.totalorder %s1452_s28, 3 }
   0xe   : > { %1795 = sst [smem:[#allocation8_spill]] %s1794_s19 }
   0xf   : > { %p392_p9 = pnand %p1170_p7, %p391_p8 }
  0x10   : > { %s1172_s15 = sshll.u32 (!%p392_p9), %s1548_s29, 1  ;;  %s432_s22 = sand.u32 (!%p392_p9), 1, %s1444_s26  }
  0x11   : > { %395 = sbr.rel (%p392_p9) target bundleno = 853 (0x355), region = 72  ;;  %p436_p10 = scmp.lt.s32.totalorder (!%p392_p9), %s1172_s15, 3 }
  0x12   : > { %s1171_s23 = sshll.u32 (!%p392_p9), %s432_s22, 4  ;;  %s1198_s30 = sshll.u32 (!%p392_p9), %s1548_s29, 8 }
  0x13   : > { %s434_s19 = scalar_lea.vmem (!%p392_p9), [#allocation2], %s1171_s23  ;;  %s1728_s16 = scalar_lea.hbm (!%p392_p9), %s1785_s13, %s1198_s30 }
  0x14   : > { %s1105_s24 = sshll.u32 (!%p392_p9), %s434_s19, 4  ;;  %s1454_s27 = smov (!%p392_p9), [#allocation2]   ;;  %s1723_s24 = int_to_ptr.vmem [resolvable:$true] %s1105_s24 }
  0x15   : > { %s1392_s29 = scalar_lea.vmem (!%p392_p9), %s1723_s24, 256  ;;  %s1396_s23 = sshll.u32 (!%p392_p9), %s1454_s27, 4  ;;  %s1397_s23 = int_to_ptr.vmem [resolvable:$false] %s1396_s23 }
  0x16   : > { %v450_v0 = vld [vmem:[%s1773_s1 + $0x30] sm:$0xff]  ;;  %v449_v2 = vld [vmem:[%s1773_s1 + $0x28] sm:$0xff]  ;;  %v448_v4 = vld [vmem:[%s1773_s1 + $0x20] sm:$0xff]  ;;  %s1803_s15 = smov (!%p436_p10, %s1172_s15), 3  ;;  %vm458_vm0 = vcmask 457728   ;;  %vm644_vm1 = vcmask 261120   ;;  %p1393_p11 = scmp.ne.s32.totalorder %s1723_s24, %s1392_s29 }
  0x17   : > { %v548_v1 = vld [vmem:[%s1775_s3 + $0x30] sm:$0xff]  ;;  %1252 = vmatprep.subr.mxu0 %v450_v0  ;;  %v547_v3 = vld [vmem:[%s1775_s3 + $0x28] sm:$0xff]  ;;  %v546_v5 = vld [vmem:[%s1775_s3 + $0x20] sm:$0xff]  ;;  %s1173_s20 = sshll.u32 %s1803_s15, 3  ;;  %vm803_vm2 = vcmask 130048   ;;  %vm913_vm3 = vcmask 523264   ;;  %p1399_p0 = scmp.lt.s32.totalorder %s1723_s24, %s1397_s23 }
  0x18   : > { %1269 = vmatprep.subr.mxu1 %v548_v1  ;;  %1253 = vmatpush3.msra.mxu0 %v450_v0  ;;  %v447_v6 = vld [vmem:[%s1773_s1 + $0x18] sm:$0xff]  ;;  %v446_v8 = vld [vmem:[%s1773_s1 + $0x10] sm:$0xff]  ;;  %v445_v10 = vld [vmem:[%s1773_s1 + $0x8] sm:$0xff]  ;;  %s439_s21 = scalar_lea.vmem %s1772_s0, %s1173_s20  ;;  %p1394_p12 = pnand %p1393_p11, %p1565_p5 }
  0x19   : > { %1270 = vmatpush3.msra.mxu1 %v548_v1  ;;  %1254 = vmatprep.subr.mxu0 %v449_v2  ;;  %v545_v7 = vld [vmem:[%s1775_s3 + $0x18] sm:$0xff]  ;;  %v544_v9 = vld [vmem:[%s1775_s3 + $0x10] sm:$0xff]  ;;  %v543_v11 = vld [vmem:[%s1775_s3 + $0x8] sm:$0xff]  ;;  %s1398_s14 = scalar_lea.vmem %s1397_s23, 512 }
  0x1a   : > { %1271 = vmatprep.subr.mxu1 %v547_v3  ;;  %1255 = vmatpush3.msra.mxu0 %v449_v2  ;;  %v444_v12 = vld [vmem:[%s1773_s1] sm:$0xff]  ;;  %v443_v15 = vld [vmem:[%s439_s21 + $0x8] sm:$0xff]  ;;  %v639_v16 = vld [vmem:[%s1777_s5 + $0x30] sm:$0xff]  ;;  %p1395_p13 = pneg %p1394_p12  ;;  %p1400_p1 = scmp.lt.s32.totalorder %s1398_s14, %s1392_s29 }
  0x1b   : > { %1272 = vmatpush3.msra.mxu1 %v547_v3  ;;  %1256 = vmatprep.subr.mxu0 %v448_v4  ;;  %v542_v13 = vld [vmem:[%s1775_s3] sm:$0xff]  ;;  %v638_v17 = vld [vmem:[%s1777_s5 + $0x28] sm:$0xff]  ;;  %v636_v19 = vld [vmem:[%s1777_s5 + $0x18] sm:$0xff] }
  0x1c   : > { %1273 = vmatprep.subr.mxu1 %v546_v5  ;;  %1257 = vmatpush3.msra.mxu0 %v448_v4  ;;  %v442_v14 = vld [vmem:[%s439_s21] sm:$0xff]  ;;  %v635_v20 = vld [vmem:[%s1777_s5 + $0x10] sm:$0xff]  ;;  %v643_v21 = vld [vmem:[%s1778_s6 + $0x18] sm:$0xff]  ;;  %s1732_s21 = scalar_lea.sflag [#allocation3], %s432_s22  ;;  %p1401_p2 = por %p1400_p1, %p1399_p0 }
  0x1d   : > { %1274 = vmatpush3.msra.mxu1 %v546_v5  ;;  %1258 = vmatprep.subr.mxu0 %v447_v6  ;;  %v637_v18 = vld [vmem:[%s1777_s5 + $0x20] sm:$0xff]  ;;  %v634_v22 = vld [vmem:[%s1777_s5 + $0x8] sm:$0xff]  ;;  %v642_v23 = vld [vmem:[%s1778_s6 + $0x10] sm:$0xff] }
  0x1e   : > { %1275 = vmatprep.subr.mxu1 %v545_v7  ;;  %1259 = vmatpush3.msra.mxu0 %v447_v6  ;;  %v633_v24 = vld [vmem:[%s1777_s5] sm:$0xff]  ;;  %v641_v25 = vld [vmem:[%s1778_s6 + $0x8] sm:$0xff]  ;;  %v905_v29 = vld [vmem:[%s1781_s9 + $0x38] sm:$0xff]  ;;  %p1402_p3 = pnand %p1401_p2, %p1395_p13 }
  0x1f   : > { %1276 = vmatpush3.msra.mxu1 %v545_v7  ;;  %1260 = vmatprep.subr.mxu0 %v446_v8  ;;  %v802_v26 = vld [vmem:[%s1779_s7 + $0x8] sm:$0xff]  ;;  %v640_v27 = vld [vmem:[%s1778_s6] sm:$0xff]  ;;  %v904_v44 = vld [vmem:[%s1781_s9 + $0x30] sm:$0xff] }
  0x20   : > { %1277 = vmatprep.subr.mxu1 %v544_v9  ;;  %1261 = vmatpush3.msra.mxu0 %v446_v8  ;;  %v801_v28 = vld [vmem:[%s1779_s7] sm:$0xff]  ;;  %v903_v45 = vld [vmem:[%s1781_s9 + $0x28] sm:$0xff]  ;;  %v901_v47 = vld [vmem:[%s1781_s9 + $0x18] sm:$0xff] }
  0x21   : > { %1278 = vmatpush3.msra.mxu1 %v544_v9  ;;  %1262 = vmatprep.subr.mxu0 %v445_v10  ;;  %v1177_v30 = vld [vmem:[%s1776_s4] ss:$0 sm:$0xff]  ;;  %v900_v48 = vld [vmem:[%s1781_s9 + $0x10] sm:$0xff]  ;;  %v899_v49 = vld [vmem:[%s1781_s9 + $0x8] sm:$0xff] }
  0x22   : > { %1279 = vmatprep.subr.mxu1 %v543_v11  ;;  %1263 = vmatpush3.msra.mxu0 %v445_v10  ;;  %v1174_v31 = vld [vmem:[%s1774_s2] ss:$0 sm:$0xff]  ;;  %v1000_v2 = vld [vmem:[%s1783_s11 + $0x18] sm:$0xff]  ;;  %v999_v3 = vld [vmem:[%s1783_s11 + $0x10] sm:$0xff] }
  0x23   : > { %1280 = vmatpush3.msra.mxu1 %v543_v11  ;;  %1264 = vmatprep.subr.mxu0 %v444_v12  ;;  %v902_v46 = vld [vmem:[%s1781_s9 + $0x20] sm:$0xff]  ;;  %v998_v4 = vld [vmem:[%s1783_s11 + $0x8] sm:$0xff] }
  0x24   : > { %1281 = vmatprep.subr.mxu1 %v542_v13  ;;  %1265 = vmatpush3.msra.mxu0 %v444_v12  ;;  %v898_v50 = vld [vmem:[%s1781_s9] sm:$0xff] }
  0x25   : > { %1266 = vmatprep.mubr.msk.f32.mxu0 %vm458_vm0, %v442_v14  ;;  %1282 = vmatpush3.msra.mxu1 %v542_v13  ;;  %v1186_v58 = vld [vmem:[%s1780_s8] ss:$0 sm:$0xff] }
  0x26   : > { %1283 = vmatprep.mubr.msk.f32.mxu1 %vm458_vm0, %v442_v14  ;;  %1267 = vmatmul.mubr.msk.f32.vlgmr.msra.gmra.mxu0 %vm458_vm0, %v443_v15  ;;  %v997_v5 = vld [vmem:[%s1783_s11] sm:$0xff] }
  0x27   : > { %1284 = vmatmul.mubr.msk.f32.vlgmr.msra.gmra.mxu1 %vm458_vm0, %v443_v15  ;;  %1297 = vmatprep.subr.mxu1 %v639_v16  ;;  %v1187_v6 = vld [vmem:[%s1782_s10] ss:$0 sm:$0xff] }
  0x28   : > { %1311 = vmatprep.mubr.msk.f32.mxu1 %vm458_vm0, %v442_v14  ;;  %1298 = vmatpush3.msra.mxu1 %v639_v16  ;;  %v1190_v13 = vld [vmem:[%s1784_s12] ss:$0 sm:$0xff] }
  0x29   : > { %1299 = vmatprep.subr.mxu1 %v638_v17  ;;  %1286 = vmatprep.subr.mxu0 %v643_v21 }
  0x2a   : > { %1300 = vmatpush3.msra.mxu1 %v638_v17  ;;  %1287 = vmatpush3.msra.mxu0 %v643_v21 }
  0x2b   : > { %1301 = vmatprep.subr.mxu1 %v637_v18  ;;  %1288 = vmatprep.subr.mxu0 %v642_v23 }
  0x2c   : > { %1302 = vmatpush3.msra.mxu1 %v637_v18  ;;  %1289 = vmatpush3.msra.mxu0 %v642_v23 }
  0x2d   : > { %1303 = vmatprep.subr.mxu1 %v636_v19  ;;  %1290 = vmatprep.subr.mxu0 %v641_v25 }
  0x2e   : > { %1304 = vmatpush3.msra.mxu1 %v636_v19  ;;  %1291 = vmatpush3.msra.mxu0 %v641_v25 }
  0x2f   : > { %1305 = vmatprep.subr.mxu1 %v635_v20  ;;  %1292 = vmatprep.subr.mxu0 %v640_v27 }
  0x30   : > { %1306 = vmatpush3.msra.mxu1 %v635_v20  ;;  %1293 = vmatpush3.msra.mxu0 %v640_v27 }
  0x31   : > { %1307 = vmatprep.subr.mxu1 %v634_v22  ;;  %1321 = vmatprep.subr.mxu0 %v905_v29 }
  0x32   : > { %1308 = vmatpush3.msra.mxu1 %v634_v22 }
  0x33   : > { %1309 = vmatprep.subr.mxu1 %v633_v24 }
  0x34   : > { %1310 = vmatpush3.msra.mxu1 %v633_v24 }
  0x35   : > { %1312 = vmatmul.mubr.msk.f32.vlgmr.msra.gmra.mxu1 %vm458_vm0, %v443_v15  ;;  %1314 = vmatprep.subr.mxu1 %v802_v26 }
  0x36   : > { %1315 = vmatpush3.msra.mxu1 %v802_v26 }
  0x37   : > { %1316 = vmatprep.subr.mxu1 %v801_v28 }
  0x38   : > { %1317 = vmatpush3.msra.mxu1 %v801_v28 }
  0x39   : > { %1340 = vmatprep.subr.mxu1 %v1000_v2 }
  0xe6   : > { %v1268_v32 = vpop.f32.mrf.mxu0 }
  0xe7   : > { %v1285_v33 = vpop.f32.mrf.mxu1  ;;  %v537_v35 = vadd.f32 %v1268_v32, %v1174_v31 }
  0xe8   : > { %v628_v34 = vadd.f32 %v1285_v33, %v1177_v30  ;;  %v531_v36 = vpop.f32.mrf.mxu0 }
  0xe9   : > { %v622_v37 = vpop.f32.mrf.mxu1  ;;  %v532_v38 = vadd.f32 %v1174_v31, %v531_v36  ;;  %v541_v43 = vmax.f32 %v537_v35, 0.0 }
  0xea   : > { %v623_v39 = vadd.f32 %v1177_v30, %v622_v37  ;;  %v632_v40 = vmax.f32 %v628_v34, 0.0 }
  0xeb   : > { %v540_v41 = vmax.f32 %v532_v38, 0.0 }
  0xec   : > { %v631_v42 = vmax.f32 %v623_v39, 0.0 }
  0xed   : > { %1294 = vmatprep.mubr.msk.f32.mxu0 %vm644_vm1, %v540_v41 }
  0xee   : > { %1318 = vmatprep.mubr.msk.f32.mxu1 %vm803_vm2, %v631_v42  ;;  %1295 = vmatmul.mubr.msk.f32.vlgmr.msra.gmra.mxu0 %vm644_vm1, %v541_v43 }
  0xef   : > { %1319 = vmatmul.mubr.msk.f32.vlgmr.msra.gmra.mxu1 %vm803_vm2, %v632_v40  ;;  %1322 = vmatpush3.msra.mxu0 %v905_v29 }
  0xf0   : > { %1323 = vmatprep.subr.mxu0 %v904_v44  ;;  %1341 = vmatpush3.msra.mxu1 %v1000_v2 }
  0xf1   : > { %1324 = vmatpush3.msra.mxu0 %v904_v44  ;;  %1342 = vmatprep.subr.mxu1 %v999_v3 }
  0xf2   : > { %1325 = vmatprep.subr.mxu0 %v903_v45  ;;  %1343 = vmatpush3.msra.mxu1 %v999_v3 }
  0xf3   : > { %1326 = vmatpush3.msra.mxu0 %v903_v45  ;;  %1344 = vmatprep.subr.mxu1 %v998_v4 }
  0xf4   : > { %1327 = vmatprep.subr.mxu0 %v902_v46  ;;  %1345 = vmatpush3.msra.mxu1 %v998_v4 }
  0xf5   : > { %1328 = vmatpush3.msra.mxu0 %v902_v46  ;;  %v1313_v51 = vpop.f32.mrf.mxu1  ;;  %1346 = vmatprep.subr.mxu1 %v997_v5 }
  0xf6   : > { %1329 = vmatprep.subr.mxu0 %v901_v47  ;;  %1347 = vmatpush3.msra.mxu1 %v997_v5 }
  0xf7   : > { %1330 = vmatpush3.msra.mxu0 %v901_v47  ;;  %v792_v52 = vpop.f32.mrf.mxu1 }
  0xf8   : > { %1331 = vmatprep.subr.mxu0 %v900_v48 }
  0xf9   : > { %1332 = vmatpush3.msra.mxu0 %v900_v48 }
  0xfa   : > { %1333 = vmatprep.subr.mxu0 %v899_v49 }
  0xfb   : > { %1334 = vmatpush3.msra.mxu0 %v899_v49 }
  0xfc   : > { %1335 = vmatprep.subr.mxu0 %v898_v50 }
  0xfd   : > { %1336 = vmatpush3.msra.mxu0 %v898_v50 }
 0x1ae   : > { %v1296_v53 = vpop.f32.mrf.mxu0 }
 0x1af   : > { %v1320_v54 = vpop.f32.mrf.mxu1  ;;  %v798_v55 = vadd.f32 %v1313_v51, %v1296_v53 }
 0x1b0   : > { %v717_v56 = vpop.f32.mrf.mxu0 }
 0x1b1   : > { %v886_v57 = vadd.f32 %v1320_v54, %v798_v55  ;;  %v793_v59 = vadd.f32 %v792_v52, %v717_v56  ;;  %v876_v60 = vpop.f32.mrf.mxu1 }
 0x1b3   : > { %v885_v61 = vadd.f32 %v876_v60, %v793_v59  ;;  %v895_v62 = vadd.f32 %v1186_v58, %v886_v57 }
 0x1b5   : > { %v894_v63 = vadd.f32 %v1186_v58, %v885_v61  ;;  %v897_v1 = vmax.f32 %v895_v62, 0.0 }
 0x1b7   : > { %v896_v0 = vmax.f32 %v894_v63, 0.0 }
 0x1b9   : > { %1337 = vmatprep.mubr.msk.f32.mxu0 %vm913_vm3, %v896_v0 }
 0x1ba   : > { %1338 = vmatmul.mubr.msk.f32.vlgmr.msra.gmra.mxu0 %vm913_vm3, %v897_v1 }
 0x27a   : > { %v1339_v7 = vpop.f32.mrf.mxu0 }
 0x27b   : > { %v992_v8 = vadd.f32 %v1339_v7, %v1187_v6 }
 0x27c   : > { %v986_v9 = vpop.f32.mrf.mxu0 }
 0x27d   : > { %v987_v10 = vadd.f32 %v1187_v6, %v986_v9  ;;  %v996_v12 = vmax.f32 %v992_v8, 0.0 }
 0x27f   : > { %v995_v11 = vmax.f32 %v987_v10, 0.0 }
 0x281   : > { %1348 = vmatprep.mubr.msk.f32.mxu1 %vm644_vm1, %v995_v11 }
 0x282   : > { %1349 = vmatmul.mubr.msk.f32.vlgmr.msra.gmra.mxu1 %vm644_vm1, %v996_v12 }
 0x342   : > { %v1350_v14 = vpop.f32.mrf.mxu1 }
 0x343   : > { %v1086_v15 = vadd.f32 %v1350_v14, %v1190_v13 }
 0x344   : > { %v1080_v16 = vpop.f32.mrf.mxu1 }
 0x345   : > { %1090 = vst.msk [vmem:[%s434_s19 + $0x8] sm:$0xff] %vm644_vm1, %v1086_v15  ;;  %v1081_v17 = vadd.f32 %v1190_v13, %v1080_v16 }
 0x347   : > { %1089 = vst.msk [vmem:[%s434_s19] sm:$0xff] %vm644_vm1, %v1081_v17 }
 0x348   : > { %1405 = shalt.err (!%p1402_p3)
}
 0x349   : > { %s1406_s22 = scalar_lea.hbm %s1728_s16, 256  ;;  %s1410_s30 = scalar_lea.hbm %s1785_s13, 512 }
 0x34a   : > { %p1407_p4 = scmp.ne.s32.totalorder %s1728_s16, %s1406_s22  ;;  %p1411_p9 = scmp.lt.s32.totalorder %s1728_s16, %s1785_s13 }
 0x34b   : > { %p1412_p10 = scmp.lt.s32.totalorder %s1410_s30, %s1406_s22 }
 0x34c   : > { %p1408_p7 = pnand %p1407_p4, %p1565_p5 }
 0x34d   : > { %p1413_p11 = por %p1412_p10, %p1411_p9 }
 0x34e   : > { %p1409_p8 = pneg %p1408_p7 }
 0x350   : > { %p1414_p12 = pnand %p1413_p11, %p1409_p8 }
 0x352   : > { %1417 = shalt.err (!%p1414_p12)
}
 0x353   : > { %s1455_s29 = smov 128   ;;  %s1456_s27 = smov 8  }
 0x354   : > { %1351 = dma.vmem_to_hbm [thread:$0]  (%p1565_p5), %s1723_s24, 256, %s1728_s16, %s1732_s21, %s1455_s29, %s1455_s29, %s1456_s27  }
 0x355 PF: > { %p1357_p13 = scmp.ge.s32.totalorder %s1452_s28, 2  ;;  %s1120_s14 = sand.u32 1, %s1440_s25  }
 0x356   : > { %s1121_s22 = scalar_lea.sflag [#allocation3], %s1120_s14 }
 0x357   : > { %p1354_p0 = pnand %p1357_p13, %p1569_p6 }
 0x359   : > { %p1355_p1 = pneg %p1354_p0 }
 0x35b   : > { %1435 = dma.done.wait (%p1355_p1), %s1121_s22, 256  }
 0x35c   : > { %1437 = vsyncadd (%p1355_p1), %s1121_s22, 4294967040  ;;  %s1797_s28 = sld [smem:[#allocation6_spill]]  ;;  %s1800_s25 = smov %s1444_s26 }
 0x35d   : > { %s1798_s20 = sld [smem:[#allocation5_spill]] }
 0x35e   : > { %s1799_s27 = sld [smem:[#allocation7_spill]] }
 0x362   : > { %p23_p2 = scmp.ge.s32.totalorder %s1797_s28, 4  }
 0x363   : > { %s1801_s26 = smov %s1798_s20 }
 0x364   :  { %25 = sbr.rel (!%p23_p2) target bundleno = 3 (0x3), region = 107 }
 0x369   :  { %1126 = vsyncpa [#allocation3], 1 }
 0x36a   :  { %1128 = vsyncpa [#allocation3 + $0x1], 1 }

</bundles_post_ra>
